<compile_context>
chip_gen: v6e
topology: v6e:2x2x1
jax: 0.10.0
libtpu: 0.0.40
codegen_flags: <defaults>
</compile_context>

<pallas_src>
import numpy as np
import jax
import jax.numpy as jnp
from jax.experimental import pallas as pl
from jax.experimental.pallas import tpu as pltpu


# --------------------------------------------------------------------------- #
# Interpolation weights (resize + center-crop composed into one matrix)
# --------------------------------------------------------------------------- #
def _resize_crop_matrix(in_size: int, resize_size: int, crop_size: int) -> np.ndarray:
    """(crop_size, in_size) matrix implementing 1-D bilinear resize
    (PyTorch antialias=False, align_corners=False) followed by a center crop."""
    scale = in_size / resize_size
    rows = np.zeros((resize_size, in_size), dtype=np.float64)
    for i in range(resize_size):
        src = max(0.0, (i + 0.5) * scale - 0.5)        # PyTorch clamps src >= 0
        i0 = min(int(np.floor(src)), in_size - 1)
        i1 = min(i0 + 1, in_size - 1)
        lam = src - i0
        rows[i, i0] += 1.0 - lam
        rows[i, i1] += lam
    top = int(round((resize_size - crop_size) / 2.0))  # torchvision center_crop
    return rows[top:top + crop_size].astype(np.float32)


# --------------------------------------------------------------------------- #
# Small helpers
# --------------------------------------------------------------------------- #
def _vmem_capacity_bytes() -> int:
    """Per-core VMEM capacity; conservative fallback = 64 MiB (v7x per-core)."""
    try:
        return int(pltpu.get_tpu_info().vmem_capacity_bytes)
    except Exception:
        return 64 * 1024 * 1024


def _sublane(dtype) -> int:
    """Second-minor tile granularity for a dtype (f32->8, bf16->16, u8->32)."""
    itemsize = jnp.dtype(dtype).itemsize
    return max(8, 8 * (4 // max(1, itemsize)))


def _choose_bt(T: int, n_parallel: int, valid, fits) -> int:
    """Pick frames-per-block Bt.

    * only divisors of T that satisfy the block-shape alignment rule (valid)
    * largest one whose TOTAL per-step VMEM footprint fits the budget (fits);
      if none fits, the SMALLEST valid divisor (never a silent over-budget T)
    * prefer >= 2 total grid steps (pipeline overlap, v7x dual-TC) and an even
      total step count.
    """
    divisors = [b for b in range(1, T + 1) if T % b == 0]
    valid_divs = [b for b in divisors if valid(b)]
    if not valid_divs:
        valid_divs = [T]                       # full-extent block is always legal
    fitting = [b for b in valid_divs if fits(b)]
    pool = fitting if fitting else [min(valid_divs)]
    multi = [b for b in pool if n_parallel * (T // b) >= 2]
    if multi:
        pool = multi
    even = [b for b in pool if (n_parallel * (T // b)) % 2 == 0]
    if even:
        pool = even
    return max(pool)


# --------------------------------------------------------------------------- #
# Kernels
# --------------------------------------------------------------------------- #
def _make_separable_kernel(Bt, C, H, scale_c, bias_c, out_dtype):
    """Primary path.

    x_ref  : (1, Bt*C*H, W)   original dtype
    rwT_ref: (W, Wc)          f32, grid-invariant (stays resident in VMEM)
    rh_ref : (Hc, H)          f32, grid-invariant (includes the 1/max fold)
    o_ref  : (1, C, Bt, Hc, Wc)  -> the (N,C,T,Hc,Wc) permute is fused here.
    """
    def kernel(x_ref, rwT_ref, rh_ref, o_ref):
        # Step 1: one big MXU matmul over all Bt*C frames (merged channels ->
        # full M-occupancy): resize+crop along W.
        x = x_ref[0].astype(jnp.float32)                               # (Bt*C*H, W)
        t1 = jnp.dot(x, rwT_ref[...], preferred_element_type=jnp.float32)  # (Bt*C*H, Wc)
        rh = rh_ref[...]                                               # (Hc, H)
        # Step 2: per-frame matmul along H; each result is stored straight to
        # its (n, c, t) slot, fusing the permute and the per-channel normalize.
        for i in range(Bt):
            for c in range(C):
                f = i * C + c
                frame = t1[f * H:(f + 1) * H, :]                       # (H, Wc)
                y = jnp.dot(rh, frame, preferred_element_type=jnp.float32)  # (Hc, Wc)
                o_ref[0, c, i] = (y * scale_c[c] - bias_c[c]).astype(out_dtype)
    return kernel


def _make_kron_kernel(C, HW, scale_c, bias_c, out_dtype):
    """Small-frame path (kron(rh, rw) weight fits comfortably in VMEM and HW is
    a multiple of 128, so the per-channel lane slices below are aligned views).

    x_ref : (1, Bt, C*H*W)   original dtype
    kT_ref: (H*W, HWc_pad)   f32 kron(rh, rw)^T (columns zero-padded to 128k)
    o_ref : (1, C, Bt, HWc_pad)
    """
    def kernel(x_ref, kT_ref, o_ref):
        kT = kT_ref[...]
        for c in range(C):                                # C is tiny; static unroll
            xc = x_ref[0, :, c * HW:(c + 1) * HW].astype(jnp.float32)   # (Bt, HW)
            y = jnp.dot(xc, kT, preferred_element_type=jnp.float32)     # (Bt, HWc_pad)
            o_ref[0, c] = (y * scale_c[c] - bias_c[c]).astype(out_dtype)
    return kernel


# --------------------------------------------------------------------------- #
# Wrapper (forward pass of VideoClassification)
# --------------------------------------------------------------------------- #
def video_classification_forward(
    vid,
    *,
    crop_size=(8, 8),
    resize_size=(12, 12),
    mean=(0.43216, 0.394666, 0.37645),
    std=(0.22803, 0.22145, 0.216989),
    out_dtype=jnp.float32,
    path=None,                   # None/"auto" | "separable" | "kron" (for testing)
):
    need_squeeze = vid.ndim < 5
    if need_squeeze:
        vid = vid[None]
    N, T, C, H, W = vid.shape
    Hr, Wr = resize_size
    Hc, Wc = crop_size
    HW, HWc = H * W, Hc * Wc

    in_dt = jnp.dtype(vid.dtype)
    out_dt = jnp.dtype(out_dtype)

    # convert_image_dtype: integer inputs rescale to [0,1]; fold into weights.
    if jnp.issubdtype(in_dt, jnp.integer):
        dscale = 1.0 / float(jnp.iinfo(in_dt).max)
    else:
        dscale = 1.0

    rh = _resize_crop_matrix(H, Hr, Hc) * np.float32(dscale)   # (Hc, H), scale folded
    rw = _resize_crop_matrix(W, Wr, Wc)                        # (Wc, W)

    inv_std = tuple(1.0 / float(s) for s in std)
    bias = tuple(float(m) * s for m, s in zip(mean, inv_std))  # mean/std per channel

    # ---- generation-aware VMEM budget -------------------------------------
    vmem_cap = _vmem_capacity_bytes()
    vmem_limit = int(vmem_cap * 3 // 4)          # ~96 MiB on 128 MiB parts, 48 MiB on v7x
    headroom = 2 * 1024 * 1024
    budget = max(int(vmem_limit * 0.8) - headroom, 4 * 1024 * 1024)
    sub_in = _sublane(in_dt)

    # ---- path selection -----------------------------------------------------
    HWc_pad = ((HWc + 127) // 128) * 128         # lane-dense output for the kron path
    kron_ok = (HW * HWc_pad * 4 <= 2 * 1024 * 1024) and (HW % 128 == 0)
    if path in (None, "auto"):
        use_kron = kron_ok
    else:
        use_kron = (path == "kron")

    if use_kron:
        # ---- small-frame path: resize+crop as a single fused matmul --------
        kT_np = np.kron(rh, rw).T                               # (HW, HWc)
        if HWc_pad != HWc:
            kT_np = np.concatenate(
                [kT_np, np.zeros((HW, HWc_pad - HWc), np.float32)], axis=1)
        kT = jnp.asarray(kT_np, jnp.float32)

        # NOTE: grid-invariant weights are still double-buffered by the auto
        # pipeline; their 2x footprint is included in the budget (the small-kT
        # threshold above keeps this bounded).
        w_bytes = 2 * HW * HWc_pad * 4

        def fits(b):
            in_blk = 2 * b * C * HW * in_dt.itemsize            # double-buffered input
            cast = 2 * b * HW * 4                                # live f32 channel temps
            y_tmp = 2 * b * HWc_pad * 4
            out_blk = 2 * b * C * HWc_pad * out_dt.itemsize      # double-buffered output
            return w_bytes + in_blk + cast + y_tmp + out_blk <= budget

        def valid(b):
            # input block (1, Bt, C*HW) and output block (1, C, Bt, HWc_pad):
            # second-minor dim Bt must be sublane-aligned or the full extent.
            return b == T or (b % max(sub_in, 8) == 0)

        Bt = _choose_bt(T, N, valid, fits)

        x = vid.reshape(N, T, C * HW)                            # free reshape
        kernel = _make_kron_kernel(C, HW, inv_std, bias, out_dt)
        out = pl.pallas_call(
            kernel,
            out_shape=jax.ShapeDtypeStruct((N, C, T, HWc_pad), out_dt),
            grid=(N, T // Bt),
            in_specs=[
                pl.BlockSpec((1, Bt, C * HW), lambda n, t: (n, t, 0)),
                pl.BlockSpec((HW, HWc_pad), lambda n, t: (0, 0)),   # grid-invariant
            ],
            out_specs=pl.BlockSpec((1, C, Bt, HWc_pad), lambda n, t: (n, 0, t, 0)),
            compiler_params=pltpu.CompilerParams(
                dimension_semantics=("parallel", "parallel"),
                vmem_limit_bytes=vmem_limit),
        )(x, kT)
        out = out[..., :HWc].reshape(N, C, T, Hc, Wc)            # strip lane padding

    else:
        # ---- primary path: separable two-matmul formulation -----------------
        rwT = jnp.asarray(rw.T)                                  # (W, Wc)
        rhj = jnp.asarray(rh)                                    # (Hc, H)
        w_bytes = 2 * (W * Wc + Hc * H) * 4                      # tiny

        def fits(b):
            in_blk = 2 * b * C * H * W * in_dt.itemsize          # double-buffered input
            cast = b * C * H * W * 4                             # in-kernel f32 copy
            t1 = b * C * H * Wc * 4                              # step-1 intermediate
            out_blk = 2 * b * C * Hc * Wc * out_dt.itemsize      # double-buffered output
            y_tmp = 2 * Hc * Wc * 4
            return w_bytes + in_blk + cast + t1 + out_blk + y_tmp <= budget

        def valid(b):
            # input block (1, Bt*C*H, W): second-minor Bt*C*H must be sublane-
            # aligned or the full extent; cap the static per-frame unroll.
            aligned = (b == T) or ((b * C * H) % sub_in == 0)
            return aligned and (b * C <= 128)

        Bt = _choose_bt(T, N, valid, fits)

        x = vid.reshape(N, T * C * H, W)                         # free reshape
        kernel = _make_separable_kernel(Bt, C, H, inv_std, bias, out_dt)
        out = pl.pallas_call(
            kernel,
            out_shape=jax.ShapeDtypeStruct((N, C, T, Hc, Wc), out_dt),
            grid=(N, T // Bt),
            in_specs=[
                pl.BlockSpec((1, Bt * C * H, W), lambda n, t: (n, t, 0)),
                pl.BlockSpec((W, Wc), lambda n, t: (0, 0)),      # grid-invariant
                pl.BlockSpec((Hc, H), lambda n, t: (0, 0)),      # grid-invariant
            ],
            out_specs=pl.BlockSpec((1, C, Bt, Hc, Wc), lambda n, t: (n, 0, t, 0, 0)),
            compiler_params=pltpu.CompilerParams(
                dimension_semantics=("parallel", "parallel"),
                vmem_limit_bytes=vmem_limit),
        )(x, rwT, rhj)

    if need_squeeze:
        out = out[0]
    return out


# --------------------------------------------------------------------------- #
# Pure-JAX reference (same interpolation matrices; validates the kernel path)
# --------------------------------------------------------------------------- #
def _reference(vid, crop_size, resize_size, mean, std):
    vid = jnp.asarray(vid)
    if jnp.issubdtype(vid.dtype, jnp.integer):
        x = vid.astype(jnp.float32) / float(jnp.iinfo(vid.dtype).max)
    else:
        x = vid.astype(jnp.float32)
    N, T, C, H, W = x.shape
    rh = jnp.asarray(_resize_crop_matrix(H, resize_size[0], crop_size[0]))
    rw = jnp.asarray(_resize_crop_matrix(W, resize_size[1], crop_size[1]))
    y = jnp.einsum("ph,ntchw,qw->ntcpq", rh, x, rw)
    m = jnp.asarray(mean, jnp.float32)[None, None, :, None, None]
    s = jnp.asarray(std, jnp.float32)[None, None, :, None, None]
    y = (y - m) / s
    return y.transpose(0, 2, 1, 3, 4)


if __name__ == "__main__":
    key = jax.random.PRNGKey(0)
    k1, k2 = jax.random.split(key)

    crop_size = (8, 8)
    resize_size = (12, 12)
    mean = (0.43216, 0.394666, 0.37645)
    std = (0.22803, 0.22145, 0.216989)

    # ---- test 1: float32 input, auto path (HW=256 lane-aligned & small -> kron)
    N, T, C, H, W = 2, 4, 3, 16, 16
    vid = jax.random.uniform(k1, (N, T, C, H, W), dtype=jnp.float32)
    ref = _reference(vid, crop_size, resize_size, mean, std)
    out = jax.block_until_ready(video_classification_forward(
        vid, crop_size=crop_size, resize_size=resize_size, mean=mean, std=std))
    assert out.shape == (N, C, T, crop_size[0], crop_size[1]), out.shape
    np.testing.assert_allclose(np.asarray(out), np.asarray(ref), rtol=1e-5, atol=1e-5)

    # ---- test 2: same input, forced separable (primary / production) path
    out_sep = jax.block_until_ready(video_classification_forward(
        vid, crop_size=crop_size, resize_size=resize_size, mean=mean, std=std,
        path="separable"))
    np.testing.assert_allclose(np.asarray(out_sep), np.asarray(ref), rtol=1e-5, atol=1e-5)

    # ---- test 3: uint8 input, non-lane-aligned HW -> separable path, Bt < T
    N3, T3, C3, H3, W3 = 1, 8, 3, 24, 20
    crop3, resize3 = (12, 10), (18, 14)
    vid_u8 = jax.random.randint(k2, (N3, T3, C3, H3, W3), 0, 256,
                                dtype=jnp.int32).astype(jnp.uint8)
    ref3 = _reference(vid_u8, crop3, resize3, mean, std)
    out3 = jax.block_until_ready(video_classification_forward(
        vid_u8, crop_size=crop3, resize_size=resize3, mean=mean, std=std))
    assert out3.shape == (N3, C3, T3, crop3[0], crop3[1]), out3.shape
    np.testing.assert_allclose(np.asarray(out3), np.asarray(ref3), rtol=1e-4, atol=1e-4)

    # ---- test 4: unbatched (T, C, H, W) input path of the module
    out4 = jax.block_until_ready(video_classification_forward(
        vid[0], crop_size=crop_size, resize_size=resize_size, mean=mean, std=std))
    assert out4.shape == (C, T, crop_size[0], crop_size[1]), out4.shape
    np.testing.assert_allclose(np.asarray(out4), np.asarray(ref[0]), rtol=1e-5, atol=1e-5)

    print("KERNEL_OK")
</pallas_src>

<mosaic_0001>
module attributes {stable_mosaic.version = 11 : i64} {
  func.func @kernel(%arg0: i32, %arg1: i32, %arg2: memref<1x4x768xf32, #tpu.memory_space<vmem>>, %arg3: memref<256x128xf32, #tpu.memory_space<vmem>>, %arg4: memref<1x3x4x128xf32, #tpu.memory_space<vmem>>) attributes {dimension_semantics = [#tpu.dimension_semantics<parallel>, #tpu.dimension_semantics<parallel>], iteration_bounds = array<i64: 2, 1>, scalar_prefetch = 0 : i64, scratch_operands = 0 : i64, tpu.core_type = #tpu.core_type<tc>, window_params = [{transform_indices = @transform_0, window_bounds = array<i64: 1, 4, 768>}, {pipeline_mode = #tpu.pipeline_mode<synchronous>, transform_indices = @transform_1, window_bounds = array<i64: 256, 128>}, {transform_indices = @transform_2, window_bounds = array<i64: 1, 3, 4, 128>}]} {
    %c0 = arith.constant 0 : index
    %c0_0 = arith.constant 0 : index
    %0 = vector.load %arg3[%c0, %c0_0] : memref<256x128xf32, #tpu.memory_space<vmem>>, vector<256x128xf32>
    %c0_1 = arith.constant 0 : index
    %c0_2 = arith.constant 0 : index
    %c0_3 = arith.constant 0 : index
    %1 = vector.load %arg2[%c0_1, %c0_2, %c0_3] : memref<1x4x768xf32, #tpu.memory_space<vmem>>, vector<1x4x256xf32>
    %2 = vector.shape_cast %1 : vector<1x4x256xf32> to vector<4x256xf32>
    %cst = arith.constant dense<0.000000e+00> : vector<4x128xf32>
    %3 = tpu.matmul %2, %0, %cst {dimension_numbers = #tpu.dot_dimension_numbers<[1], [0], [0], [1], [0, 0, 1, 1], [], []>} : vector<4x256xf32>, vector<256x128xf32>, vector<4x128xf32> -> vector<4x128xf32>
    %cst_4 = arith.constant 4.3853879 : f32
    %4 = vector.broadcast %cst_4 : f32 to vector<4x128xf32>
    %5 = arith.mulf %3, %4 : vector<4x128xf32>
    %cst_5 = arith.constant 1.89518929 : f32
    %6 = vector.broadcast %cst_5 : f32 to vector<4x128xf32>
    %7 = arith.subf %5, %6 : vector<4x128xf32>
    %c0_6 = arith.constant 0 : index
    %c0_7 = arith.constant 0 : index
    %c0_8 = arith.constant 0 : index
    %c0_9 = arith.constant 0 : index
    %8 = vector.load %arg4[%c0_6, %c0_7, %c0_8, %c0_9] : memref<1x3x4x128xf32, #tpu.memory_space<vmem>>, vector<1x1x4x128xf32>
    %9 = vector.shape_cast %8 : vector<1x1x4x128xf32> to vector<4x128xf32>
    %10 = vector.shape_cast %7 : vector<4x128xf32> to vector<1x1x4x128xf32>
    tpu.vector_store %arg4[%c0_6, %c0_7, %c0_8, %c0_9], %10 {strides = array<i32>} : memref<1x3x4x128xf32, #tpu.memory_space<vmem>>, vector<1x1x4x128xf32>,
    %c0_10 = arith.constant 0 : index
    %c0_11 = arith.constant 0 : index
    %c256 = arith.constant 256 : index
    %11 = vector.load %arg2[%c0_10, %c0_11, %c256] : memref<1x4x768xf32, #tpu.memory_space<vmem>>, vector<1x4x256xf32>
    %12 = vector.shape_cast %11 : vector<1x4x256xf32> to vector<4x256xf32>
    %cst_12 = arith.constant dense<0.000000e+00> : vector<4x128xf32>
    %13 = tpu.matmul %12, %0, %cst_12 {dimension_numbers = #tpu.dot_dimension_numbers<[1], [0], [0], [1], [0, 0, 1, 1], [], []>} : vector<4x256xf32>, vector<256x128xf32>, vector<4x128xf32> -> vector<4x128xf32>
    %cst_13 = arith.constant 4.51569223 : f32
    %14 = vector.broadcast %cst_13 : f32 to vector<4x128xf32>
    %15 = arith.mulf %13, %14 : vector<4x128xf32>
    %cst_14 = arith.constant 1.78219008 : f32
    %16 = vector.broadcast %cst_14 : f32 to vector<4x128xf32>
    %17 = arith.subf %15, %16 : vector<4x128xf32>
    %c0_15 = arith.constant 0 : index
    %c1 = arith.constant 1 : index
    %c0_16 = arith.constant 0 : index
    %c0_17 = arith.constant 0 : index
    %18 = vector.load %arg4[%c0_15, %c1, %c0_16, %c0_17] : memref<1x3x4x128xf32, #tpu.memory_space<vmem>>, vector<1x1x4x128xf32>
    %19 = vector.shape_cast %18 : vector<1x1x4x128xf32> to vector<4x128xf32>
    %20 = vector.shape_cast %17 : vector<4x128xf32> to vector<1x1x4x128xf32>
    tpu.vector_store %arg4[%c0_15, %c1, %c0_16, %c0_17], %20 {strides = array<i32>} : memref<1x3x4x128xf32, #tpu.memory_space<vmem>>, vector<1x1x4x128xf32>,
    %c0_18 = arith.constant 0 : index
    %c0_19 = arith.constant 0 : index
    %c512 = arith.constant 512 : index
    %21 = vector.load %arg2[%c0_18, %c0_19, %c512] : memref<1x4x768xf32, #tpu.memory_space<vmem>>, vector<1x4x256xf32>
    %22 = vector.shape_cast %21 : vector<1x4x256xf32> to vector<4x256xf32>
    %cst_20 = arith.constant dense<0.000000e+00> : vector<4x128xf32>
    %23 = tpu.matmul %22, %0, %cst_20 {dimension_numbers = #tpu.dot_dimension_numbers<[1], [0], [0], [1], [0, 0, 1, 1], [], []>} : vector<4x256xf32>, vector<256x128xf32>, vector<4x128xf32> -> vector<4x128xf32>
    %cst_21 = arith.constant 4.60852861 : f32
    %24 = vector.broadcast %cst_21 : f32 to vector<4x128xf32>
    %25 = arith.mulf %23, %24 : vector<4x128xf32>
    %cst_22 = arith.constant 1.73488057 : f32
    %26 = vector.broadcast %cst_22 : f32 to vector<4x128xf32>
    %27 = arith.subf %25, %26 : vector<4x128xf32>
    %c0_23 = arith.constant 0 : index
    %c2 = arith.constant 2 : index
    %c0_24 = arith.constant 0 : index
    %c0_25 = arith.constant 0 : index
    %28 = vector.load %arg4[%c0_23, %c2, %c0_24, %c0_25] : memref<1x3x4x128xf32, #tpu.memory_space<vmem>>, vector<1x1x4x128xf32>
    %29 = vector.shape_cast %28 : vector<1x1x4x128xf32> to vector<4x128xf32>
    %30 = vector.shape_cast %27 : vector<4x128xf32> to vector<1x1x4x128xf32>
    tpu.vector_store %arg4[%c0_23, %c2, %c0_24, %c0_25], %30 {strides = array<i32>} : memref<1x3x4x128xf32, #tpu.memory_space<vmem>>, vector<1x1x4x128xf32>,
    return
  }
  func.func @transform_0(%arg0: i32, %arg1: i32) -> (i32, i32, i32) {
    %c0_i32 = arith.constant 0 : i32
    %c0_i32_0 = arith.constant 0 : i32
    return %arg0, %arg1, %c0_i32 : i32, i32, i32
  }
  func.func @transform_1(%arg0: i32, %arg1: i32) -> (i32, i32) {
    %c0_i32 = arith.constant 0 : i32
    %c0_i32_0 = arith.constant 0 : i32
    %c0_i32_1 = arith.constant 0 : i32
    return %c0_i32, %c0_i32_0 : i32, i32
  }
  func.func @transform_2(%arg0: i32, %arg1: i32) -> (i32, i32, i32, i32) {
    %c0_i32 = arith.constant 0 : i32
    %c0_i32_0 = arith.constant 0 : i32
    %c0_i32_1 = arith.constant 0 : i32
    return %arg0, %c0_i32, %arg1, %c0_i32_0 : i32, i32, i32, i32
  }
}

</mosaic_0001>

<bundles_post_ra>
// kernel: tpu_custom_call.1
= control target key start
LH: loop header
LB: loop body
LE: loop exit
PB: predicated region body
PF: predicated region fallthrough
CT: control target
= control target key end

     0   :  { %7 = vsyncpa [#allocation3], 0  ;;  %s1243_s0 = inlined_call_operand.hbm [shape: f32[2,4,768], index: 0, kind: input, shape index: {}]   ;;  %s1244_s1 = inlined_call_operand.hbm [shape: f32[256,128], index: 1, kind: input, shape index: {}]   ;;  %s1245_s2 = inlined_call_operand.hbm [shape: f32[2,3,4,128], index: 2, kind: output, shape index: {}]  }
   0x1   :  { %9 = vsyncpa [#allocation3 + $0x1], 0 }
   0x2   :  { %10 = vsyncpa [#allocation6], 0 }
   0x3   :  { %11 = vsyncpa [#allocation4], 0 }
   0x4   :  { %13 = vsyncpa [#allocation4 + $0x1], 0  ;;  %s937_s9 = smov 0   ;;  %s939_s10 = smov 0  }
   0x5   :  { %s941_s11 = smov 0   ;;  %s943_s12 = smov 0  }
   0x6   :  { %s945_s13 = smov 0   ;;  %s947_s14 = smov 0  }
   0x7 LB: > { %s569_s15 = sadd.s32 4294967295, %s913_s14   ;;  %s570_s16 = sadd.s32 4294967294, %s913_s14   ;;  %s913_s14 = sphi %s947_s14, %s19_s14   ;;  %s909_s13 = sphi %s945_s13, %s1261_s13   ;;  %s905_s12 = sphi %s943_s12, %s1260_s12   ;;  %s901_s11 = sphi %s941_s11, %s1259_s11   ;;  %s897_s10 = sphi %s939_s10, %s1258_s10   ;;  %s893_s9 = sphi %s937_s9, %s1257_s9  }
   0x8   : > { %p53_p0 = scmp.ne.s32.totalorder %s897_s10, %s893_s9  ;;  %p971_p1 = scmp.eq.s32.totalorder %s569_s15, 0 }
   0x9   : > { %p975_p2 = scmp.eq.s32.totalorder %s569_s15, 1  ;;  %p106_p3 = scmp.eq.s32.totalorder %s570_s16, 1 }
   0xa   : > { %p981_p4 = por %p971_p1, %p53_p0  ;;  %p571_p5 = scmp.ge.s32.totalorder %s913_s14, 1 }
   0xb   : > { %p986_p6 = por %p106_p3, %p53_p0  ;;  %p113_p7 = scmp.lt.s32.totalorder %s913_s14, 3 }
   0xc   : > { %s1249_s19 = scalar_select %p981_p4, 1, 0 }
   0xd   : > { %s1250_s20 = scalar_select %p986_p6, 1, 0 }
   0xe   : > { %p991_p8 = pnand %p571_p5, %p113_p7  ;;  %s915_s22 = smov [#allocation5]  }
   0xf   : > { %s125_s23 = sshll.u32 %s915_s22, 4  ;;  %p573_p10 = scmp.ge.s32.totalorder %s913_s14, 2  ;;  %s126_s23 = int_to_ptr.vmem [resolvable:$true] %s125_s23 }
  0x10   : > { %p703_p9 = pneg %p991_p8  ;;  %s31_s25 = sadd.s32 1, %s909_s13 }
  0x11   : > { %s786_s26 = scalar_lea.vmem %s126_s23, 4096  ;;  %p794_p5 = scmp.lt.s32.totalorder %s126_s23, %s126_s23 }
  0x12   : > { %p1000_p11 = pnand %p703_p9, %p971_p1  ;;  %p787_p13 = scmp.ne.s32.totalorder %s126_s23, %s786_s26 }
  0x13   : > { %p795_p7 = scmp.lt.s32.totalorder %s786_s26, %s786_s26 }
  0x14   : > { %p777_p12 = pneg %p1000_p11 }
  0x15   : > { %p796_p6 = por %p795_p7, %p794_p5 }
  0x16   : > { %p789_p0 = pnand %p787_p13, %p777_p12 }
  0x18   : > { %p790_p3 = pneg %p789_p0 }
  0x1a   : > { %p797_p4 = pnand %p796_p6, %p790_p3 }
  0x1c   : > { %800 = shalt.err (!%p797_p4)
}
  0x1d   : > { %s916_s27 = smov 128   ;;  %s917_s28 = smov 8  }
  0x1e   : > { %706 = dma.hbm_to_vmem [thread:$0]  (!%p1000_p11), %s1244_s1, 4096, %s126_s23, [#allocation6], %s916_s27, %s916_s27, %s917_s28  }
  0x1f   : > { %p33_p6 = scmp.ge.s32.totalorder %s31_s25, 2  ;;  %s40_s3 = sadd.s32 1, %s901_s11 }
  0x20   : > { %p47_p4 = scmp.ne.s32.totalorder %s901_s11, %s897_s10  ;;  %p48_p9 = scmp.eq.s32.totalorder %s913_s14, 0 }
  0x21   : > { %s1263_s25 = smov (%p33_p6, %s31_s25), 0  ;;  %p716_p0 = scmp.lt.s32.totalorder %s913_s14, 2 }
  0x22   : > { %p49_p12 = por %p48_p9, %p47_p4  ;;  %p1020_p13 = por %p975_p2, %p47_p4 }
  0x23   : > { %s35_s5 = ssub.s32 %s909_s13, %s1263_s25  ;;  %s139_s6 = sand.u32 1, %s901_s11  }
  0x24   : > { %p38_p3 = scmp.eq.s32.totalorder %s35_s5, 0  ;;  %s690_s7 = smul.u32 24, %s139_s6 }
  0x25   : > { %s691_s15 = smul.u32 384, %s909_s13  ;;  %p1032_p11 = pnand %p716_p0, %p49_p12 }
  0x26   : > { %s1029_s8 = scalar_select %p38_p3, %s901_s11, %s40_s3  }
  0x27   : > { %s143_s16 = scalar_lea.vmem [#allocation2], %s690_s7  ;;  %s151_s26 = scalar_lea.hbm %s1243_s0, %s691_s15 }
  0x28   : > { %s153_s22 = sshll.u32 %s143_s16, 4  ;;  %s140_s27 = scalar_lea.sflag [#allocation3], %s139_s6  ;;  %s154_s22 = int_to_ptr.vmem [resolvable:$true] %s153_s22 }
  0x29   : > { %p803_p2 = pneg %p1032_p11  ;;  %s814_s28 = scalar_lea.vmem %s154_s22, 384 }
  0x2a   : > { %p815_p5 = scmp.ne.s32.totalorder %s154_s22, %s814_s28  ;;  %s918_s29 = smov [#allocation2]  }
  0x2b   : > { %s819_s30 = sshll.u32 %s918_s29, 4  ;;  %s820_s30 = int_to_ptr.vmem [resolvable:$false] %s819_s30 }
  0x2c   : > { %p817_p7 = pnand %p815_p5, %p803_p2  ;;  %s821_s3 = scalar_lea.vmem %s820_s30, 768 }
  0x2d   : > { %p822_p4 = scmp.lt.s32.totalorder %s154_s22, %s820_s30  ;;  %p823_p9 = scmp.lt.s32.totalorder %s821_s3, %s814_s28 }
  0x2e   : > { %p818_p6 = pneg %p817_p7 }
  0x2f   : > { %p824_p12 = por %p823_p9, %p822_p4 }
  0x31   : > { %p825_p0 = pnand %p824_p12, %p818_p6 }
  0x33   : > { %828 = shalt.err (!%p825_p0)
}
  0x34   : > { %710 = dma.hbm_to_vmem [thread:$0]  (!%p1032_p11), %s151_s26, 384, %s154_s22, %s140_s27  }
  0x35   : > { %162 = sbr.rel (%p991_p8) target bundleno = 341 (0x155), region = 28  ;;  %s1046_s5 = sand.u32 (!%p991_p8), 1, %s897_s10  }
  0x36   : > { %s692_s6 = smul.u32 (!%p991_p8), 24, %s1046_s5  ;;  %s165_s7 = scalar_lea.sflag (!%p991_p8), [#allocation3], %s1046_s5 }
  0x37   : > { %p1255_p3 = scmp.ne.s32.totalorder (!%p991_p8), %s1249_s19, 0 }
  0x38   : > { %s1050_s15 = scalar_lea.vmem (!%p991_p8), [#allocation2], %s692_s6 }
  0x3a   : > { %880 = dma.done.wait (%p1255_p3), %s165_s7, 384  }
  0x3b   : > { %882 = vsyncadd (%p1255_p3), %s165_s7, 4294966912 }
  0x3c   : > { %884 = dma.done.wait (%p971_p1), [#allocation6], 4096  }
  0x3d   : > { %886 = vsyncadd (%p971_p1), [#allocation6], 4294963200  ;;  %v1060_v0 = vld [vmem:[#allocation5 + $0xf8] sm:$0xff]  ;;  %v1064_v2 = vld [vmem:[#allocation5 + $0xf0] sm:$0xff]  ;;  %s693_s17 = smul.u32 12, %s1046_s5  ;;  %s459_s18 = scalar_lea.sflag [#allocation4], %s1046_s5 }
  0x3e   : > { %v1062_v1 = vld [vmem:[#allocation5 + $0x78] sm:$0xff]  ;;  %585 = vmatprep.subr.mxu0 %v1060_v0  ;;  %v1067_v3 = vld [vmem:[#allocation5 + $0x70] sm:$0xff]  ;;  %620 = vmatprep.subr.mxu1 %v1060_v0  ;;  %v1071_v4 = vld [vmem:[#allocation5 + $0xe8] sm:$0xff]  ;;  %s694_s16 = smul.u32 192, %s905_s12  ;;  %s919_s12 = smov [#allocation7]  }
  0x3f   : > { %586 = vmatpush3.msra.mxu0 %v1062_v1  ;;  %621 = vmatpush3.msra.mxu1 %v1062_v1  ;;  %v1075_v5 = vld [vmem:[#allocation5 + $0x68] sm:$0xff]  ;;  %v1079_v6 = vld [vmem:[#allocation5 + $0xe0] sm:$0xff]  ;;  %v1087_v8 = vld [vmem:[#allocation5 + $0xd8] sm:$0xff]  ;;  %s192_s19 = scalar_lea.vmem [#allocation7], %s693_s17  ;;  %s833_s27 = sshll.u32 %s919_s12, 4  ;;  %s834_s27 = int_to_ptr.vmem [resolvable:$false] %s833_s27 }
  0x40   : > { %587 = vmatprep.subr.mxu0 %v1064_v2  ;;  %622 = vmatprep.subr.mxu1 %v1064_v2  ;;  %v1083_v7 = vld [vmem:[#allocation5 + $0x60] sm:$0xff]  ;;  %v1091_v9 = vld [vmem:[#allocation5 + $0x58] sm:$0xff]  ;;  %v1095_v10 = vld [vmem:[#allocation5 + $0xd0] sm:$0xff]  ;;  %s473_s21 = sshll.u32 %s192_s19, 4  ;;  %s1195_s24 = scalar_lea.hbm %s1245_s2, %s694_s16  ;;  %s1190_s21 = int_to_ptr.vmem [resolvable:$true] %s473_s21 }
  0x41   : > { %588 = vmatpush3.msra.mxu0 %v1067_v3  ;;  %623 = vmatpush3.msra.mxu1 %v1067_v3  ;;  %v1099_v11 = vld [vmem:[#allocation5 + $0x50] sm:$0xff]  ;;  %v1103_v12 = vld [vmem:[#allocation5 + $0xc8] sm:$0xff]  ;;  %v1116_v16 = vld [vmem:[#allocation5 + $0xc0] sm:$0xff]  ;;  %s829_s26 = scalar_lea.vmem %s1190_s21, 192  ;;  %s835_s28 = scalar_lea.vmem %s834_s27, 384 }
  0x42   : > { %589 = vmatprep.subr.mxu0 %v1071_v4  ;;  %624 = vmatprep.subr.mxu1 %v1071_v4  ;;  %v1106_v13 = vld [vmem:[%s1050_s15] sm:$0xff]  ;;  %v1120_v17 = vld [vmem:[#allocation5 + $0x40] sm:$0xff]  ;;  %v1123_v18 = vld [vmem:[#allocation5 + $0xb8] sm:$0xff]  ;;  %p830_p1 = scmp.ne.s32.totalorder %s1190_s21, %s829_s26  ;;  %p836_p2 = scmp.lt.s32.totalorder %s1190_s21, %s834_s27 }
  0x43   : > { %590 = vmatpush3.msra.mxu0 %v1075_v5  ;;  %625 = vmatpush3.msra.mxu1 %v1075_v5  ;;  %v1110_v14 = vld [vmem:[#allocation5 + $0x48] sm:$0xff]  ;;  %v227_v15 = vcombine.high %v1106_v13, %v1106_v13  ;;  %v1127_v19 = vld [vmem:[#allocation5 + $0x38] sm:$0xff]  ;;  %v1131_v20 = vld [vmem:[#allocation5 + $0xb0] sm:$0xff]  ;;  %p837_p5 = scmp.lt.s32.totalorder %s835_s28, %s829_s26 }
  0x44   : > { %591 = vmatprep.subr.mxu0 %v1079_v6  ;;  %626 = vmatprep.subr.mxu1 %v1079_v6  ;;  %v1135_v21 = vld [vmem:[#allocation5 + $0x30] sm:$0xff]  ;;  %v1139_v22 = vld [vmem:[#allocation5 + $0xa8] sm:$0xff]  ;;  %v1147_v24 = vld [vmem:[#allocation5 + $0xa0] sm:$0xff]  ;;  %p831_p8 = pnand %p830_p1, %p1020_p13 }
  0x45   : > { %592 = vmatpush3.msra.mxu0 %v1083_v7  ;;  %627 = vmatpush3.msra.mxu1 %v1083_v7  ;;  %v1143_v23 = vld [vmem:[#allocation5 + $0x28] sm:$0xff]  ;;  %v1151_v25 = vld [vmem:[#allocation5 + $0x20] sm:$0xff]  ;;  %v212_v26 = vld [vmem:[#allocation5 + $0x98] sm:$0xff]  ;;  %p838_p7 = por %p837_p5, %p836_p2 }
  0x46   : > { %593 = vmatprep.subr.mxu0 %v1087_v8  ;;  %628 = vmatprep.subr.mxu1 %v1087_v8  ;;  %v196_v27 = vld [vmem:[#allocation5 + $0x18] sm:$0xff]  ;;  %v211_v28 = vld [vmem:[#allocation5 + $0x90] sm:$0xff]  ;;  %v210_v30 = vld [vmem:[#allocation5 + $0x88] sm:$0xff]  ;;  %p832_p11 = pneg %p831_p8 }
  0x47   : > { %594 = vmatpush3.msra.mxu0 %v1091_v9  ;;  %629 = vmatpush3.msra.mxu1 %v1091_v9  ;;  %v195_v29 = vld [vmem:[#allocation5 + $0x10] sm:$0xff]  ;;  %v194_v31 = vld [vmem:[#allocation5 + $0x8] sm:$0xff]  ;;  %v209_v32 = vld [vmem:[#allocation5 + $0x80] sm:$0xff] }
  0x48   : > { %595 = vmatprep.subr.mxu0 %v1095_v10  ;;  %630 = vmatprep.subr.mxu1 %v1095_v10  ;;  %v302_v33 = vld [vmem:[%s1050_s15 + $0x8] sm:$0xff]  ;;  %v193_v34 = vld [vmem:[#allocation5] sm:$0xff]  ;;  %p839_p6 = pnand %p838_p7, %p832_p11 }
  0x49   : > { %596 = vmatpush3.msra.mxu0 %v1099_v11  ;;  %631 = vmatpush3.msra.mxu1 %v1099_v11  ;;  %v380_v35 = vld [vmem:[%s1050_s15 + $0x10] sm:$0xff]  ;;  %v304_v36 = vcombine.high %v302_v33, %v302_v33 }
  0x4a   : > { %597 = vmatprep.subr.mxu0 %v1103_v12  ;;  %293 = vmatprep.mubr.f32.mxu0 %v227_v15  ;;  %v382_v37 = vcombine.high %v380_v35, %v380_v35 }
  0x4b   : > { %598 = vmatpush3.msra.mxu0 %v1110_v14  ;;  %632 = vmatprep.subr.mxu1 %v1103_v12 }
  0x4c   : > { %599 = vmatprep.subr.mxu0 %v1116_v16  ;;  %633 = vmatpush3.msra.mxu1 %v1110_v14 }
  0x4d   : > { %600 = vmatpush3.msra.mxu0 %v1120_v17  ;;  %634 = vmatprep.subr.mxu1 %v1116_v16 }
  0x4e   : > { %601 = vmatprep.subr.mxu0 %v1123_v18  ;;  %635 = vmatpush3.msra.mxu1 %v1120_v17 }
  0x4f   : > { %602 = vmatpush3.msra.mxu0 %v1127_v19  ;;  %636 = vmatprep.subr.mxu1 %v1123_v18 }
  0x50   : > { %603 = vmatprep.subr.mxu0 %v1131_v20  ;;  %637 = vmatpush3.msra.mxu1 %v1127_v19 }
  0x51   : > { %604 = vmatpush3.msra.mxu0 %v1135_v21  ;;  %638 = vmatprep.subr.mxu1 %v1131_v20 }
  0x52   : > { %605 = vmatprep.subr.mxu0 %v1139_v22  ;;  %639 = vmatpush3.msra.mxu1 %v1135_v21 }
  0x53   : > { %606 = vmatpush3.msra.mxu0 %v1143_v23  ;;  %640 = vmatprep.subr.mxu1 %v1139_v22 }
  0x54   : > { %607 = vmatprep.subr.mxu0 %v1147_v24  ;;  %641 = vmatpush3.msra.mxu1 %v1143_v23 }
  0x55   : > { %608 = vmatpush3.msra.mxu0 %v1151_v25  ;;  %642 = vmatprep.subr.mxu1 %v1147_v24 }
  0x56   : > { %609 = vmatprep.subr.mxu0 %v212_v26  ;;  %643 = vmatpush3.msra.mxu1 %v1151_v25 }
  0x57   : > { %610 = vmatpush3.msra.mxu0 %v196_v27  ;;  %644 = vmatprep.subr.mxu1 %v212_v26 }
  0x58   : > { %611 = vmatprep.subr.mxu0 %v211_v28  ;;  %645 = vmatpush3.msra.mxu1 %v196_v27 }
  0x59   : > { %612 = vmatpush3.msra.mxu0 %v195_v29  ;;  %646 = vmatprep.subr.mxu1 %v211_v28 }
  0x5a   : > { %613 = vmatprep.subr.mxu0 %v210_v30  ;;  %647 = vmatpush3.msra.mxu1 %v195_v29 }
  0x5b   : > { %614 = vmatpush3.msra.mxu0 %v194_v31  ;;  %648 = vmatprep.subr.mxu1 %v210_v30 }
  0x5c   : > { %615 = vmatprep.subr.mxu0 %v209_v32  ;;  %649 = vmatpush3.msra.mxu1 %v194_v31 }
  0x5d   : > { %616 = vmatpush3.msra.mxu0 %v193_v34  ;;  %650 = vmatprep.subr.mxu1 %v209_v32 }
  0x5e   : > { %294 = vmatmul.mubr.f32.vlgmr.msra.gmra.mxu0 %v1106_v13  ;;  %655 = vmatprep.subr.mxu0 %v1060_v0 }
  0x5f   : > { %656 = vmatpush3.msra.mxu0 %v1062_v1  ;;  %651 = vmatpush3.msra.mxu1 %v193_v34 }
  0x60   : > { %657 = vmatprep.subr.mxu0 %v1064_v2  ;;  %370 = vmatprep.mubr.f32.mxu1 %v304_v36 }
  0x61   : > { %658 = vmatpush3.msra.mxu0 %v1067_v3  ;;  %371 = vmatmul.mubr.f32.vlgmr.msra.gmra.mxu1 %v302_v33 }
  0x62   : > { %659 = vmatprep.subr.mxu0 %v1071_v4  ;;  %448 = vmatprep.mubr.f32.mxu0 %v382_v37 }
  0x63   : > { %660 = vmatpush3.msra.mxu0 %v1075_v5 }
  0x64   : > { %661 = vmatprep.subr.mxu0 %v1079_v6 }
  0x65   : > { %662 = vmatpush3.msra.mxu0 %v1083_v7 }
  0x66   : > { %663 = vmatprep.subr.mxu0 %v1087_v8 }
  0x67   : > { %664 = vmatpush3.msra.mxu0 %v1091_v9 }
  0x68   : > { %665 = vmatprep.subr.mxu0 %v1095_v10 }
  0x69   : > { %666 = vmatpush3.msra.mxu0 %v1099_v11 }
  0x6a   : > { %667 = vmatprep.subr.mxu0 %v1103_v12 }
  0x6b   : > { %668 = vmatpush3.msra.mxu0 %v1110_v14 }
  0x6c   : > { %669 = vmatprep.subr.mxu0 %v1116_v16 }
  0x6d   : > { %670 = vmatpush3.msra.mxu0 %v1120_v17 }
  0x6e   : > { %671 = vmatprep.subr.mxu0 %v1123_v18 }
  0x6f   : > { %672 = vmatpush3.msra.mxu0 %v1127_v19 }
  0x70   : > { %673 = vmatprep.subr.mxu0 %v1131_v20 }
  0x71   : > { %674 = vmatpush3.msra.mxu0 %v1135_v21 }
  0x72   : > { %675 = vmatprep.subr.mxu0 %v1139_v22 }
  0x73   : > { %676 = vmatpush3.msra.mxu0 %v1143_v23 }
  0x74   : > { %677 = vmatprep.subr.mxu0 %v1147_v24 }
  0x75   : > { %678 = vmatpush3.msra.mxu0 %v1151_v25 }
  0x76   : > { %679 = vmatprep.subr.mxu0 %v212_v26 }
  0x77   : > { %680 = vmatpush3.msra.mxu0 %v196_v27 }
  0x78   : > { %681 = vmatprep.subr.mxu0 %v211_v28 }
  0x79   : > { %682 = vmatpush3.msra.mxu0 %v195_v29 }
  0x7a   : > { %683 = vmatprep.subr.mxu0 %v210_v30 }
  0x7b   : > { %684 = vmatpush3.msra.mxu0 %v194_v31 }
  0x7c   : > { %685 = vmatprep.subr.mxu0 %v209_v32 }
  0x7d   : > { %686 = vmatpush3.msra.mxu0 %v193_v34 }
  0x7e   : > { %449 = vmatmul.mubr.f32.vlgmr.msra.gmra.mxu0 %v380_v35 }
 0x11e   : > { %v617_v38 = vpop.f32.mrf.mxu0 }
 0x120   : > { %v618_v39 = vpop.f32.mrf.mxu0 }
 0x121   : > { %v619_v40 = vadd.f32 %v618_v39, %v617_v38  ;;  %v652_v41 = vpop.f32.mrf.mxu1 }
 0x123   : > { %v299_v42 = vmul.f32 4.385388, %v619_v40  ;;  %v653_v43 = vpop.f32.mrf.mxu1 }
 0x124   : > { %v654_v44 = vadd.f32 %v653_v43, %v652_v41 }
 0x125   : > { %v577_v45 = vadd.f32 -1.8951893, %v299_v42 }
 0x126   : > { %v376_v46 = vmul.f32 4.515692, %v654_v44 }
 0x127   : > { %301 = vst [vmem:[%s192_s19] sm:$0xf] %v577_v45 }
 0x128   : > { %v578_v47 = vadd.f32 -1.7821901, %v376_v46 }
 0x12a   : > { %579 = vst [vmem:[%s192_s19 + $0x4] sm:$0xf] %v578_v47 }
 0x13e   : > { %v687_v48 = vpop.f32.mrf.mxu0 }
 0x140   : > { %v688_v49 = vpop.f32.mrf.mxu0 }
 0x141   : > { %v689_v50 = vadd.f32 %v688_v49, %v687_v48 }
 0x143   : > { %v454_v51 = vmul.f32 4.6085286, %v689_v50 }
 0x145   : > { %v580_v52 = vadd.f32 -1.7348806, %v454_v51 }
 0x147   : > { %581 = vst [vmem:[%s192_s19 + $0x8] sm:$0xf] %v580_v52 }
 0x148   : > { %842 = shalt.err (!%p839_p6)
}
 0x149   : > { %s843_s29 = scalar_lea.hbm %s1195_s24, 192  ;;  %s847_s6 = scalar_lea.hbm %s1245_s2, 384 }
 0x14a   : > { %p844_p4 = scmp.ne.s32.totalorder %s1195_s24, %s843_s29  ;;  %p848_p0 = scmp.lt.s32.totalorder %s1195_s24, %s1245_s2 }
 0x14b   : > { %p849_p3 = scmp.lt.s32.totalorder %s847_s6, %s843_s29 }
 0x14c   : > { %p845_p9 = pnand %p844_p4, %p1020_p13 }
 0x14d   : > { %p850_p1 = por %p849_p3, %p848_p0 }
 0x14e   : > { %p846_p12 = pneg %p845_p9 }
 0x150   : > { %p851_p8 = pnand %p850_p1, %p846_p12 }
 0x152   : > { %854 = shalt.err (!%p851_p8)
}
 0x153   : > { %s920_s17 = smov 64   ;;  %s921_s19 = smov 4  }
 0x154   : > { %701 = dma.vmem_to_hbm [thread:$0]  (%p1020_p13), %s1190_s21, 192, %s1195_s24, %s459_s18, %s920_s17, %s920_s17, %s921_s19  }
 0x155 PF: > { %s488_s16 = sand.u32 1, %s893_s9   ;;  %p1256_p11 = scmp.ne.s32.totalorder %s1250_s20, 0 }
 0x156   : > { %s489_s22 = scalar_lea.sflag [#allocation4], %s488_s16 }
 0x157   : > { %p712_p2 = pnand %p573_p10, %p1256_p11 }
 0x159   : > { %p713_p5 = pneg %p712_p2 }
 0x15b   : > { %888 = dma.done.wait (%p713_p5), %s489_s22, 192  }
 0x15c   : > { %890 = vsyncadd (%p713_p5), %s489_s22, 4294967104  ;;  %s19_s14 = sadd.s32 1, %s913_s14   ;;  %s1257_s9 = smov %s897_s10 }
 0x15d   : > { %p16_p7 = scmp.ge.s32.totalorder %s19_s14, 4   ;;  %s1258_s10 = smov %s901_s11 }
 0x15e   : > { %s1259_s11 = smov %s1029_s8  ;;  %s1260_s12 = smov %s909_s13 }
 0x15f   : > { %s1261_s13 = smov %s1263_s25  ;;  %18 = sbr.rel (!%p16_p7) target bundleno = 7 (0x7), region = 79 }
 0x164   :  { %494 = vsyncpa [#allocation3], 1 }
 0x165   :  { %496 = vsyncpa [#allocation3 + $0x1], 1 }
 0x166   :  { %497 = vsyncpa [#allocation6], 1 }
 0x167   :  { %498 = vsyncpa [#allocation4], 1 }
 0x168   :  { %500 = vsyncpa [#allocation4 + $0x1], 1 }

</bundles_post_ra>
